<compile_context>
chip_gen: v7x
topology: tpu7x:2x2x1
jax: 0.10.0
libtpu: 0.0.40
codegen_flags: <defaults>
</compile_context>

<pallas_src>
import functools

import jax
import jax.numpy as jnp
from jax.experimental import pallas as pl
from jax.experimental.pallas import tpu as pltpu


def _ffn_kernel(x_ref, w1_ref, b1_ref, w2_ref, b2_ref, o_ref):
    # x_ref:  (tm, E) bf16     w1_ref: (E, th) bf16    b1_ref: (1, th) f32
    # w2_ref: (th, E) bf16     b2_ref: (1, E)  f32     o_ref:  (tm, E) f32
    # o_ref's block index is constant along k, so it stays resident in VMEM
    # across the hidden-dim reduction and doubles as the f32 accumulator.
    k = pl.program_id(1)

    @pl.when(k == 0)
    def _():
        o_ref[...] = jnp.zeros_like(o_ref)

    # First matmul + bias + ReLU on the current hidden slice.
    h = jnp.dot(x_ref[...], w1_ref[...], preferred_element_type=jnp.float32)
    h = jnp.maximum(h + b1_ref[...], 0.0)

    # Second matmul: accumulate this hidden slice's contribution in f32.
    o_ref[...] += jnp.dot(h.astype(w2_ref.dtype), w2_ref[...],
                          preferred_element_type=jnp.float32)

    @pl.when(k == pl.num_programs(1) - 1)
    def _():
        o_ref[...] += b2_ref[...]


def _round_up(x, m):
    return ((x + m - 1) // m) * m


def _cdiv(a, b):
    return (a + b - 1) // b


def _chip_config():
    """Per-generation row-tile target, VMEM budget, and megacore hint."""
    vmem_cap = 128 * 1024 * 1024
    try:
        vmem_cap = int(pltpu.get_tpu_info().vmem_capacity_bytes)
    except Exception:
        pass
    kind = ""
    try:
        kind = jax.devices()[0].device_kind.lower()
    except Exception:
        pass
    two_cores = ("v7" in kind) or (vmem_cap <= 64 * 1024 * 1024)
    if vmem_cap <= 64 * 1024 * 1024:
        # v7x: 64 MiB VMEM / TC, ~311 FLOPs/byte crossover -> tm=512 is enough.
        return {"tm": 512, "vmem_limit": 52 * 1024 * 1024, "two_cores": two_cores}
    if "v5" in kind:
        # v5e: 197 TF/s vs ~820 GB/s (~240 FLOPs/byte) -> tm=512 has headroom.
        return {"tm": 512, "vmem_limit": 64 * 1024 * 1024, "two_cores": two_cores}
    # v6e (default): needs ~650 FLOPs/byte -> big row tile + raised VMEM cap.
    return {"tm": 1024, "vmem_limit": 100 * 1024 * 1024, "two_cores": two_cores}


def _pick_hidden_tile(H, th_max=512):
    """Returns (padded H, hidden tile). H is padded to a multiple of 128 so a
    lane/MXU-friendly tile always divides; padded hidden units are exact no-ops
    (zero weight columns/rows and zero bias)."""
    Hp = _round_up(H, 128)
    if Hp <= th_max:
        return Hp, Hp
    for cand in (th_max, 512, 384, 256, 128):
        if cand <= th_max and Hp % cand == 0:
            return Hp, cand
    return Hp, 128  # Hp is a multiple of 128, so this always divides


def _pick_row_tile(M, E, th, cfg):
    """Row tile: multiple of 16 (bf16 packs 2 rows/sublane), capped by the
    per-chip target, >=2 parallel grid steps on 2-TC parts, and clamped so the
    VMEM footprint stays inside the budget."""
    tm = min(cfg["tm"], _round_up(M, 16))
    if cfg["two_cores"] and M > 32 and _cdiv(M, tm) < 2:
        tm = max(16, _round_up(_cdiv(M, 2), 16))

    def footprint(t):
        x_b = t * E * 2                 # x bf16, single-buffered
        out_b = 2 * t * E * 4           # output f32, double-buffered
        w_b = 2 * 2 * (E * th * 2)      # w1 + w2 bf16 slices, double-buffered
        bias_b = 2 * 2 * (th + E) * 4   # biases, double-buffered
        return x_b + out_b + w_b + bias_b

    while tm > 16 and footprint(tm) > cfg["vmem_limit"]:
        tm = max(16, (tm // 2 // 16) * 16 or 16)
    return tm


def _block_spec(shape, index_map, buffers=None):
    """BlockSpec with optional pipeline depth; falls back if unsupported."""
    if buffers is not None and hasattr(pl, "Buffered"):
        try:
            return pl.BlockSpec(shape, index_map, pipeline_mode=pl.Buffered(buffers))
        except TypeError:
            pass
    return pl.BlockSpec(shape, index_map)


@functools.partial(jax.jit,
                   static_argnames=("tm", "th", "mp", "hp", "vmem_limit"))
def _feed_forward_impl(x, w1, b1, w2, b2, *, tm, th, mp, hp, vmem_limit):
    B, T, E = x.shape
    M = B * T
    H = w1.shape[1]

    # bf16 activations/weights for the MXU; f32 biases; pad rows/hidden dim.
    x2 = x.reshape(M, E).astype(jnp.bfloat16)
    if mp != M:
        x2 = jnp.pad(x2, ((0, mp - M), (0, 0)))
    w1b = w1.astype(jnp.bfloat16)
    w2b = w2.astype(jnp.bfloat16)
    b1f = b1.reshape(1, H).astype(jnp.float32)
    b2f = b2.reshape(1, E).astype(jnp.float32)
    if hp != H:
        w1b = jnp.pad(w1b, ((0, 0), (0, hp - H)))
        b1f = jnp.pad(b1f, ((0, 0), (0, hp - H)))
        w2b = jnp.pad(w2b, ((0, hp - H), (0, 0)))

    grid = (mp // tm, hp // th)
    n_row_tiles = grid[0]

    cost = pl.CostEstimate(
        flops=4 * mp * E * hp,                              # two matmuls
        transcendentals=0,
        bytes_accessed=(mp * E * 2                          # x (bf16 read)
                        + n_row_tiles * 2 * E * hp * 2      # w1+w2 re-streamed per row tile
                        + n_row_tiles * (hp + E) * 4        # biases per row tile
                        + mp * E * 4),                      # output (f32 write)
    )

    out2 = pl.pallas_call(
        _ffn_kernel,
        out_shape=jax.ShapeDtypeStruct((mp, E), jnp.float32),
        grid_spec=pltpu.PrefetchScalarGridSpec(
            num_scalar_prefetch=0,
            grid=grid,
            in_specs=[
                _block_spec((tm, E), lambda i, k: (i, 0), buffers=1),  # x: i-only stream
                _block_spec((E, th), lambda i, k: (0, k)),             # w1 hidden slice
                _block_spec((1, th), lambda i, k: (0, k)),             # b1 hidden slice
                _block_spec((th, E), lambda i, k: (k, 0)),             # w2 hidden slice
                _block_spec((1, E), lambda i, k: (0, 0)),              # b2
            ],
            out_specs=_block_spec((tm, E), lambda i, k: (i, 0)),       # resident over k
        ),
        compiler_params=pltpu.CompilerParams(
            dimension_semantics=("parallel", "arbitrary"),
            vmem_limit_bytes=vmem_limit,
        ),
        cost_estimate=cost,
    )(x2, w1b, b1f, w2b, b2f)

    return out2[:M].reshape(B, T, E)


def feed_forward(x, w1, b1, w2, b2):
    """x: (B, T, E) f32; w1: (E, 4E); b1: (1, 4E); w2: (4E, E); b2: (1, E)."""
    B, T, E = x.shape
    M = B * T
    H = w1.shape[1]
    cfg = _chip_config()
    hp, th = _pick_hidden_tile(H)
    tm = _pick_row_tile(M, E, th, cfg)
    mp = _round_up(M, tm)
    return _feed_forward_impl(x, w1, b1, w2, b2,
                              tm=tm, th=th, mp=mp, hp=hp,
                              vmem_limit=cfg["vmem_limit"])


def init_params(key, emb_dim):
    """Deterministic init matching nn.Linear shapes (uniform +/- 1/sqrt(fan_in))."""
    hid = 4 * emb_dim
    k1, k2, k3, k4 = jax.random.split(key, 4)
    lim1 = 1.0 / jnp.sqrt(emb_dim)
    lim2 = 1.0 / jnp.sqrt(hid)
    w1 = jax.random.uniform(k1, (emb_dim, hid), jnp.float32, -lim1, lim1)
    b1 = jax.random.uniform(k2, (1, hid), jnp.float32, -lim1, lim1)
    w2 = jax.random.uniform(k3, (hid, emb_dim), jnp.float32, -lim2, lim2)
    b2 = jax.random.uniform(k4, (1, emb_dim), jnp.float32, -lim2, lim2)
    return w1, b1, w2, b2


def _bf16_reference(x, w1, b1, w2, b2):
    """Same cast points as the kernel (bf16 MXU feeds, f32 accumulation)."""
    B, T, E = x.shape
    x2 = x.reshape(B * T, E).astype(jnp.bfloat16)
    h = jnp.dot(x2, w1.astype(jnp.bfloat16), preferred_element_type=jnp.float32) + b1
    h = jnp.maximum(h, 0.0)
    o = jnp.dot(h.astype(jnp.bfloat16), w2.astype(jnp.bfloat16),
                preferred_element_type=jnp.float32) + b2
    return o.reshape(B, T, E)


if __name__ == "__main__":
    key = jax.random.PRNGKey(0)
    kx, kp, kx2, kp2 = jax.random.split(key, 4)

    # Small shape consistent with the module: batch=2, seq=8, emb_dim=32 (H=128).
    B, T, E = 2, 8, 32
    x = jax.random.normal(kx, (B, T, E), jnp.float32)
    w1, b1, w2, b2 = init_params(kp, E)

    out = feed_forward(x, w1, b1, w2, b2)
    jax.block_until_ready(out)
    assert out.shape == (B, T, E)

    # bf16-matched reference -> tight tolerance.
    ref_bf16 = _bf16_reference(x, w1, b1, w2, b2)
    assert jnp.allclose(out, ref_bf16, atol=2e-3, rtol=2e-3)

    # Pure f32 reference (Dropout is identity in eval mode) -> loose tolerance
    # because the kernel runs the MXU in bf16.
    ref_f32 = jnp.maximum(x @ w1 + b1[0], 0.0) @ w2 + b2[0]
    assert jnp.allclose(out, ref_f32, atol=1e-1, rtol=1e-1)

    # Larger shape exercising multiple row tiles and multiple H-reduction steps.
    B2, T2, E2 = 4, 128, 256          # M=512, H=1024 -> th=512, >=2 k-steps
    x_l = jax.random.normal(kx2, (B2, T2, E2), jnp.float32)
    w1l, b1l, w2l, b2l = init_params(kp2, E2)
    out_l = feed_forward(x_l, w1l, b1l, w2l, b2l)
    jax.block_until_ready(out_l)
    ref_l = _bf16_reference(x_l, w1l, b1l, w2l, b2l)
    assert jnp.allclose(out_l, ref_l, atol=2e-2, rtol=2e-2)

    print("KERNEL_OK")
</pallas_src>

<mosaic_0001>
module attributes {stable_mosaic.version = 11 : i64} {
  func.func @_ffn_kernel(%arg0: i32, %arg1: i32, %arg2: memref<16x32xbf16, #tpu.memory_space<vmem>>, %arg3: memref<32x128xbf16, #tpu.memory_space<vmem>>, %arg4: memref<1x128xf32, #tpu.memory_space<vmem>>, %arg5: memref<128x32xbf16, #tpu.memory_space<vmem>>, %arg6: memref<1x32xf32, #tpu.memory_space<vmem>>, %arg7: memref<16x32xf32, #tpu.memory_space<vmem>>) attributes {dimension_semantics = [#tpu.dimension_semantics<parallel>, #tpu.dimension_semantics<arbitrary>], iteration_bounds = array<i64: 1, 1>, scalar_prefetch = 0 : i64, scratch_operands = 0 : i64, tpu.core_type = #tpu.core_type<tc>, window_params = [{pipeline_mode = #tpu.pipeline_mode<synchronous>, transform_indices = @transform_0, window_bounds = array<i64: 16, 32>}, {transform_indices = @transform_1, window_bounds = array<i64: 32, 128>}, {transform_indices = @transform_2, window_bounds = array<i64: 1, 128>}, {transform_indices = @transform_3, window_bounds = array<i64: 128, 32>}, {pipeline_mode = #tpu.pipeline_mode<synchronous>, transform_indices = @transform_4, window_bounds = array<i64: 1, 32>}, {transform_indices = @transform_5, window_bounds = array<i64: 16, 32>}]} {
    %c0_i32 = arith.constant 0 : i32
    %0 = arith.cmpi eq, %arg1, %c0_i32 : i32
    %1 = arith.extui %0 : i1 to i32
    %c0_i32_0 = arith.constant 0 : i32
    %2 = arith.cmpi ne, %1, %c0_i32_0 : i32
    scf.if %2 {
      %cst_16 = arith.constant 0.000000e+00 : f32
      %20 = vector.broadcast %cst_16 : f32 to vector<16x32xf32>
      %c0_17 = arith.constant 0 : index
      %c0_18 = arith.constant 0 : index
      %21 = vector.load %arg7[%c0_17, %c0_18] : memref<16x32xf32, #tpu.memory_space<vmem>>, vector<16x32xf32>
      tpu.vector_store %arg7[%c0_17, %c0_18], %20 {strides = array<i32>} : memref<16x32xf32, #tpu.memory_space<vmem>>, vector<16x32xf32>,
    } else {
    }
    %c0 = arith.constant 0 : index
    %c0_1 = arith.constant 0 : index
    %3 = vector.load %arg2[%c0, %c0_1] : memref<16x32xbf16, #tpu.memory_space<vmem>>, vector<16x32xbf16>
    %c0_2 = arith.constant 0 : index
    %c0_3 = arith.constant 0 : index
    %4 = vector.load %arg3[%c0_2, %c0_3] : memref<32x128xbf16, #tpu.memory_space<vmem>>, vector<32x128xbf16>
    %cst = arith.constant dense<0.000000e+00> : vector<16x128xf32>
    %5 = tpu.matmul %3, %4, %cst {dimension_numbers = #tpu.dot_dimension_numbers<[1], [0], [0], [1], [0, 0, 1, 1], [], []>} : vector<16x32xbf16>, vector<32x128xbf16>, vector<16x128xf32> -> vector<16x128xf32>
    %c0_4 = arith.constant 0 : index
    %c0_5 = arith.constant 0 : index
    %6 = vector.load %arg4[%c0_4, %c0_5] : memref<1x128xf32, #tpu.memory_space<vmem>>, vector<1x128xf32>
    %7 = vector.broadcast %6 : vector<1x128xf32> to vector<16x128xf32>
    %8 = arith.addf %5, %7 : vector<16x128xf32>
    %cst_6 = arith.constant 0.000000e+00 : f32
    %9 = vector.broadcast %cst_6 : f32 to vector<16x128xf32>
    %10 = arith.maximumf %8, %9 : vector<16x128xf32>
    %c0_7 = arith.constant 0 : index
    %c0_8 = arith.constant 0 : index
    %11 = vector.load %arg7[%c0_7, %c0_8] : memref<16x32xf32, #tpu.memory_space<vmem>>, vector<16x32xf32>
    %12 = arith.truncf %10 : vector<16x128xf32> to vector<16x128xbf16>
    %c0_9 = arith.constant 0 : index
    %c0_10 = arith.constant 0 : index
    %13 = vector.load %arg5[%c0_9, %c0_10] : memref<128x32xbf16, #tpu.memory_space<vmem>>, vector<128x32xbf16>
    %cst_11 = arith.constant dense<0.000000e+00> : vector<16x32xf32>
    %14 = tpu.matmul %12, %13, %cst_11 {dimension_numbers = #tpu.dot_dimension_numbers<[1], [0], [0], [1], [0, 0, 1, 1], [], []>} : vector<16x128xbf16>, vector<128x32xbf16>, vector<16x32xf32> -> vector<16x32xf32>
    %15 = arith.addf %11, %14 : vector<16x32xf32>
    %c0_12 = arith.constant 0 : index
    %c0_13 = arith.constant 0 : index
    %16 = vector.load %arg7[%c0_12, %c0_13] : memref<16x32xf32, #tpu.memory_space<vmem>>, vector<16x32xf32>
    tpu.vector_store %arg7[%c0_12, %c0_13], %15 {strides = array<i32>} : memref<16x32xf32, #tpu.memory_space<vmem>>, vector<16x32xf32>,
    %c0_i32_14 = arith.constant 0 : i32
    %17 = arith.cmpi eq, %arg1, %c0_i32_14 : i32
    %18 = arith.extui %17 : i1 to i32
    %c0_i32_15 = arith.constant 0 : i32
    %19 = arith.cmpi ne, %18, %c0_i32_15 : i32
    scf.if %19 {
      %c0_16 = arith.constant 0 : index
      %c0_17 = arith.constant 0 : index
      %20 = vector.load %arg7[%c0_16, %c0_17] : memref<16x32xf32, #tpu.memory_space<vmem>>, vector<16x32xf32>
      %c0_18 = arith.constant 0 : index
      %c0_19 = arith.constant 0 : index
      %21 = vector.load %arg6[%c0_18, %c0_19] : memref<1x32xf32, #tpu.memory_space<vmem>>, vector<1x32xf32>
      %22 = vector.broadcast %21 : vector<1x32xf32> to vector<16x32xf32>
      %23 = arith.addf %20, %22 : vector<16x32xf32>
      %c0_20 = arith.constant 0 : index
      %c0_21 = arith.constant 0 : index
      %24 = vector.load %arg7[%c0_20, %c0_21] : memref<16x32xf32, #tpu.memory_space<vmem>>, vector<16x32xf32>
      tpu.vector_store %arg7[%c0_20, %c0_21], %23 {strides = array<i32>} : memref<16x32xf32, #tpu.memory_space<vmem>>, vector<16x32xf32>,
    } else {
    }
    return
  }
  func.func @transform_0(%arg0: i32, %arg1: i32) -> (i32, i32) {
    %c0_i32 = arith.constant 0 : i32
    %c0_i32_0 = arith.constant 0 : i32
    return %arg0, %c0_i32 : i32, i32
  }
  func.func @transform_1(%arg0: i32, %arg1: i32) -> (i32, i32) {
    %c0_i32 = arith.constant 0 : i32
    %c0_i32_0 = arith.constant 0 : i32
    return %c0_i32, %arg1 : i32, i32
  }
  func.func @transform_2(%arg0: i32, %arg1: i32) -> (i32, i32) {
    %c0_i32 = arith.constant 0 : i32
    %c0_i32_0 = arith.constant 0 : i32
    return %c0_i32, %arg1 : i32, i32
  }
  func.func @transform_3(%arg0: i32, %arg1: i32) -> (i32, i32) {
    %c0_i32 = arith.constant 0 : i32
    %c0_i32_0 = arith.constant 0 : i32
    return %arg1, %c0_i32 : i32, i32
  }
  func.func @transform_4(%arg0: i32, %arg1: i32) -> (i32, i32) {
    %c0_i32 = arith.constant 0 : i32
    %c0_i32_0 = arith.constant 0 : i32
    %c0_i32_1 = arith.constant 0 : i32
    return %c0_i32, %c0_i32_0 : i32, i32
  }
  func.func @transform_5(%arg0: i32, %arg1: i32) -> (i32, i32) {
    %c0_i32 = arith.constant 0 : i32
    %c0_i32_0 = arith.constant 0 : i32
    return %arg0, %c0_i32 : i32, i32
  }
}

</mosaic_0001>

<bundles_post_ra>
// kernel: _feed_forward_impl.1
= control target key start
LH: loop header
LB: loop body
LE: loop exit
PB: predicated region body
PF: predicated region fallthrough
CT: control target
= control target key end

     0   :  { %10 = vsyncpa [#allocation3], 0  ;;  %s671_s0 = inlined_call_operand.hbm [shape: bf16[16,32], index: 0, kind: input, shape index: {}]   ;;  %s672_s1 = inlined_call_operand.hbm [shape: bf16[32,128], index: 1, kind: input, shape index: {}]   ;;  %s673_s2 = inlined_call_operand.hbm [shape: f32[1,128], index: 2, kind: input, shape index: {}]   ;;  %s674_s3 = inlined_call_operand.hbm [shape: bf16[128,32], index: 3, kind: input, shape index: {}]   ;;  %s675_s4 = inlined_call_operand.hbm [shape: f32[1,32], index: 4, kind: input, shape index: {}]   ;;  %s676_s5 = inlined_call_operand.hbm [shape: f32[16,32], index: 5, kind: output, shape index: {}]  }
   0x1   :  { %11 = vsyncpa [#allocation6], 0 }
   0x2   :  { %12 = vsyncpa [#allocation9], 0 }
   0x3   :  { %13 = vsyncpa [#allocation4], 0  ;;  %s534_s18 = smov [#allocation5]   ;;  %s535_s20 = smov [#allocation8]  }
   0x4   :  { %s31_s19 = sshll.u32 %s534_s18, 4  ;;  %s53_s21 = sshll.u32 %s535_s20, 4  ;;  %s32_s19 = int_to_ptr.vmem [resolvable:$true] %s31_s19  ;;  %s576_s21 = int_to_ptr.vmem [resolvable:$true] %s53_s21 }
   0x5   :  { %s394_s24 = scalar_lea.hbm %s672_s1, 256 }
   0x6   :  { %p395_p0 = scmp.ne.s32.totalorder %s672_s1, %s394_s24  ;;  %p398_p1 = scmp.lt.u32.totalorder %s394_s24, %s672_s1 }
   0x8   :  { %p400_p2 = pnand %p398_p1, %p395_p0 }
   0xa   :  { %403 = shalt.err (!%p400_p2)
}
   0xb   :  { %s404_s29 = scalar_lea.vmem %s32_s19, 256  ;;  %p409_p4 = scmp.lt.s32.totalorder %s32_s19, %s32_s19 }
   0xc   :  { %p405_p3 = scmp.ne.s32.totalorder %s32_s19, %s404_s29  ;;  %p410_p5 = scmp.lt.s32.totalorder %s404_s29, %s404_s29 }
   0xe   :  { %p411_p6 = por %p410_p5, %p409_p4 }
  0x10   :  { %p412_p7 = pnand %p411_p6, %p405_p3 }
  0x12   :  { %415 = shalt.err (!%p412_p7)
}
  0x13   :  { %s536_s30 = smov 64   ;;  %s537_s6 = smov 4  }
  0x14   :  { %37 = dma.hbm_to_vmem [thread:$0]  %s672_s1, 256, %s32_s19, [#allocation6], %s536_s30, %s536_s30, %s537_s6  }
  0x15   :  { %s416_s11 = scalar_lea.hbm %s674_s3, 1024 }
  0x16   :  { %p417_p8 = scmp.ne.s32.totalorder %s674_s3, %s416_s11  ;;  %p420_p9 = scmp.lt.u32.totalorder %s416_s11, %s674_s3 }
  0x18   :  { %p422_p10 = pnand %p420_p9, %p417_p8 }
  0x1a   :  { %425 = shalt.err (!%p422_p10)
}
  0x1b   :  { %s426_s16 = scalar_lea.vmem %s576_s21, 1024  ;;  %p431_p12 = scmp.lt.s32.totalorder %s576_s21, %s576_s21 }
  0x1c   :  { %p427_p11 = scmp.ne.s32.totalorder %s576_s21, %s426_s16  ;;  %p432_p13 = scmp.lt.s32.totalorder %s426_s16, %s426_s16 }
  0x1e   :  { %p433_p0 = por %p432_p13, %p431_p12 }
  0x20   :  { %p434_p1 = pnand %p433_p0, %p427_p11 }
  0x22   :  { %437 = shalt.err (!%p434_p1)
}
  0x23   :  { %59 = dma.hbm_to_vmem [thread:$0]  %s674_s3, 1024, %s576_s21, [#allocation9], %s536_s30, %s536_s30, %s537_s6  }
  0x24   :  { %s538_s18 = smov [#allocation2]   ;;  %s539_s20 = smov [#allocation7]  }
  0x25   :  { %s19_s19 = sshll.u32 %s538_s18, 4  ;;  %s44_s22 = sshll.u32 %s539_s20, 4  ;;  %s20_s19 = int_to_ptr.vmem [resolvable:$true] %s19_s19  ;;  %s45_s22 = int_to_ptr.vmem [resolvable:$true] %s44_s22 }
  0x26   :  { %s438_s25 = scalar_lea.hbm %s671_s0, 128 }
  0x27   :  { %p439_p2 = scmp.ne.s32.totalorder %s671_s0, %s438_s25  ;;  %p442_p3 = scmp.lt.u32.totalorder %s438_s25, %s671_s0 }
  0x29   :  { %p444_p4 = pnand %p442_p3, %p439_p2 }
  0x2b   :  { %447 = shalt.err (!%p444_p4)
}
  0x2c   :  { %s448_s3 = scalar_lea.vmem %s20_s19, 128  ;;  %p453_p6 = scmp.lt.s32.totalorder %s20_s19, %s20_s19 }
  0x2d   :  { %p449_p5 = scmp.ne.s32.totalorder %s20_s19, %s448_s3  ;;  %p454_p7 = scmp.lt.s32.totalorder %s448_s3, %s448_s3 }
  0x2f   :  { %p455_p8 = por %p454_p7, %p453_p6 }
  0x31   :  { %p456_p9 = pnand %p455_p8, %p449_p5 }
  0x33   :  { %459 = shalt.err (!%p456_p9)
}
  0x34   :  { %25 = dma.hbm_to_vmem [thread:$0]  %s671_s0, 128, %s20_s19, [#allocation3], %s536_s30, %s536_s30, %s537_s6  }
  0x35   :  { %s460_s10 = scalar_lea.hbm %s673_s2, 16 }
  0x36   :  { %p461_p10 = scmp.ne.s32.totalorder %s673_s2, %s460_s10  ;;  %p464_p11 = scmp.lt.u32.totalorder %s460_s10, %s673_s2 }
  0x38   :  { %p466_p12 = pnand %p464_p11, %p461_p10 }
  0x3a   :  { %469 = shalt.err (!%p466_p12)
}
  0x3b   :  { %s470_s15 = scalar_lea.vmem %s45_s22, 16  ;;  %s474_s16 = scalar_lea.vmem %s45_s22, 32 }
  0x3c   :  { %p471_p13 = scmp.ne.s32.totalorder %s45_s22, %s470_s15  ;;  %p475_p0 = scmp.lt.s32.totalorder %s45_s22, %s45_s22 }
  0x3d   :  { %p476_p1 = scmp.lt.s32.totalorder %s474_s16, %s470_s15 }
  0x3f   :  { %p477_p2 = por %p476_p1, %p475_p0 }
  0x41   :  { %p478_p3 = pnand %p477_p2, %p471_p13 }
  0x43   :  { %481 = shalt.err (!%p478_p3)
}
  0x44   :  { %47 = dma.hbm_to_vmem [thread:$0]  %s673_s2, 16, %s45_s22, [#allocation6]  }
  0x45   :  { %s540_s6 = smov [#allocation10]   ;;  %s482_s19 = scalar_lea.hbm %s675_s4, 16 }
  0x46   :  { %s66_s1 = sshll.u32 %s540_s6, 4  ;;  %p483_p4 = scmp.ne.s32.totalorder %s675_s4, %s482_s19  ;;  %s67_s1 = int_to_ptr.vmem [resolvable:$true] %s66_s1 }
  0x47   :  { %p486_p5 = scmp.lt.u32.totalorder %s482_s19, %s675_s4 }
  0x49   :  { %p488_p6 = pnand %p486_p5, %p483_p4 }
  0x4b   :  { %491 = shalt.err (!%p488_p6)
}
  0x4c   :  { %s492_s26 = scalar_lea.vmem %s67_s1, 16  ;;  %s496_s2 = scalar_lea.vmem %s67_s1, 32 }
  0x4d   :  { %p493_p7 = scmp.ne.s32.totalorder %s67_s1, %s492_s26  ;;  %p497_p8 = scmp.lt.s32.totalorder %s67_s1, %s67_s1 }
  0x4e   :  { %p498_p9 = scmp.lt.s32.totalorder %s496_s2, %s492_s26 }
  0x50   :  { %p499_p10 = por %p498_p9, %p497_p8 }
  0x52   :  { %p500_p11 = pnand %p499_p10, %p493_p7 }
  0x54   :  { %503 = shalt.err (!%p500_p11)
}
  0x55   :  { %69 = dma.hbm_to_vmem [thread:$0]  %s675_s4, 16, %s67_s1, [#allocation9]  }
  0x56   :  { %526 = dma.done.wait [#allocation3], 128  }
  0x57   :  { %527 = vsyncadd [#allocation3], 4294967168 }
  0x58   :  { %528 = dma.done.wait [#allocation6], 272  }
  0x59   :  { %529 = vsyncadd [#allocation6], 4294967024 }
  0x5a   :  { %530 = dma.done.wait [#allocation9], 1040  }
  0x5b   :  { %531 = vsyncadd [#allocation9], 4294966256  ;;  %vm90_vm0 = vcmask 261120   ;;  %v541_v0 = vmov 0.0   ;;  %vm542_vm1 = vmmov 0   ;;  %v383_v1 = vld [vmem:[#allocation5] sm:$0xff]  }
  0x5c   :  { %343 = vmatprep.subr.bf16.mxu0 %v541_v0  ;;  %347 = vmatprep.mubr.msk.bf16.mxu0 %vm542_vm1, %v541_v0  ;;  %91 = vst.msk [vmem:[#allocation11] sm:$0xff] %vm90_vm0, %v541_v0  ;;  %92 = vst.msk [vmem:[#allocation11 + $0x8] sm:$0xff] %vm90_vm0, %v541_v0  ;;  %v384_v2 = vld [vmem:[#allocation5 + $0x8] sm:$0xff]   ;;  %v386_v3 = vld [vmem:[#allocation8] sm:$0xff]   ;;  %s543_s4 = smov [#allocation11]  }
  0x5d   :  { %351 = vmatprep.subr.bf16.mxu1 %v541_v0  ;;  %367 = vmatprep.mubr.msk.bf16.mxu1 %vm542_vm1, %v541_v0  ;;  %v385_v4 = vld [vmem:[#allocation2] sm:$0xff]   ;;  %v388_v6 = vld [vmem:[#allocation8 + $0x10] sm:$0xff]   ;;  %v389_v7 = vld [vmem:[#allocation8 + $0x18] sm:$0xff]   ;;  %s303_s28 = sshll.u32 %s543_s4, 4  ;;  %s304_s28 = int_to_ptr.vmem [resolvable:$true] %s303_s28 }
  0x5e   :  { %344 = vmatpush3.bf16.msra.mxu0 %v383_v1  ;;  %352 = vmatpush3.bf16.msra.mxu1 %v386_v3  ;;  %v387_v5 = vld [vmem:[#allocation8 + $0x8] sm:$0xff]   ;;  %v390_v8 = vld [vmem:[#allocation8 + $0x20] sm:$0xff]   ;;  %v392_v10 = vld [vmem:[#allocation8 + $0x30] sm:$0xff]   ;;  %s504_s29 = scalar_lea.vmem %s304_s28, 256  ;;  %p509_p13 = scmp.lt.s32.totalorder %s304_s28, %s304_s28 }
  0x5f   :  { %345 = vmatprep.subr.bf16.mxu0 %v541_v0  ;;  %353 = vmatprep.subr.bf16.mxu1 %v541_v0  ;;  %v391_v9 = vld [vmem:[#allocation8 + $0x28] sm:$0xff]   ;;  %v393_v11 = vld [vmem:[#allocation8 + $0x38] sm:$0xff]   ;;  %v330_v30 = vld [vmem:[#allocation10] ss:$0 sm:$0xff]  ;;  %p505_p12 = scmp.ne.s32.totalorder %s304_s28, %s504_s29  ;;  %p510_p0 = scmp.lt.s32.totalorder %s504_s29, %s504_s29 }
  0x60   :  { %v317_v12 = vld [vmem:[#allocation7] ss:$0 sm:$0xff] }
  0x61   :  { %p511_p1 = por %p510_p0, %p509_p13 }
  0x62   :  { %346 = vmatpush3.bf16.msra.mxu0 %v384_v2  ;;  %354 = vmatpush3.bf16.msra.mxu1 %v387_v5 }
  0x63   :  { %355 = vmatprep.subr.bf16.mxu1 %v541_v0  ;;  %v170_v22 = vld [vmem:[#allocation11] sm:$0xff]  ;;  %v171_v24 = vld [vmem:[#allocation11 + $0x8] sm:$0xff]  ;;  %p512_p2 = pnand %p511_p1, %p505_p12 }
  0x65   :  { %348 = vmatmul.mubr.msk.bf16.vlgmr.msra.gmra.mrb[0].mxu0 %vm90_vm0, %v385_v4 }
  0x66   :  { %356 = vmatpush3.bf16.msra.mxu1 %v388_v6 }
  0x67   :  { %357 = vmatprep.subr.bf16.mxu1 %v541_v0 }
  0x6a   :  { %358 = vmatpush3.bf16.msra.mxu1 %v389_v7 }
  0x6b   :  { %359 = vmatprep.subr.bf16.mxu1 %v541_v0 }
  0x6e   :  { %360 = vmatpush3.bf16.msra.mxu1 %v390_v8 }
  0x6f   :  { %361 = vmatprep.subr.bf16.mxu1 %v541_v0 }
  0x72   :  { %362 = vmatpush3.bf16.msra.mxu1 %v391_v9 }
  0x73   :  { %363 = vmatprep.subr.bf16.mxu1 %v541_v0 }
  0x76   :  { %364 = vmatpush3.bf16.msra.mxu1 %v392_v10 }
  0x77   :  { %365 = vmatprep.subr.bf16.mxu1 %v541_v0 }
  0x7a   :  { %366 = vmatpush3.bf16.msra.mxu1 %v393_v11 }
 0x138   :  { %v161_v13 = vpop.f32.mrb[0].mxu0 }
 0x139   :  { %v162_v14 = vadd.f32 %v317_v12, %v161_v13  ;;  %v349_v15 = vpop.f32.mrb[1].mxu0 }
 0x13a   :  { %v164_v16 = vpop.f32.mrb[2].mxu0 }
 0x13b   :  { %v165_v17 = vadd.f32 %v317_v12, %v164_v16  ;;  %v350_v18 = vpop.f32.mrb[3].mxu0  ;;  %v168_v19 = vmax.f32 %v162_v14, 0.0 }
 0x13d   :  { %v169_v20 = vmax.f32 %v165_v17, 0.0 }
 0x13f   :  { %v172_v21 = vpack.c.bf16 %v169_v20, %v168_v19 }
 0x141   :  { %368 = vmatmul.mubr.bf16.vlgmr.msra.gmra.mrb[0].mxu1 %v172_v21 }
 0x214   :  { %v271_v23 = vpop.f32.mrb[0].mxu1 }
 0x215   :  { %v278_v25 = vadd.f32 %v271_v23, %v170_v22  ;;  %v369_v26 = vpop.f32.mrb[1].mxu1 }
 0x216   :  { %v274_v27 = vpop.f32.mrb[2].mxu1 }
 0x217   :  { %280 = vst.msk [vmem:[#allocation11] sm:$0xff] %vm90_vm0, %v278_v25  ;;  %v279_v28 = vadd.f32 %v274_v27, %v171_v24  ;;  %v370_v29 = vpop.f32.mrb[3].mxu1 }
 0x219   :  { %281 = vst.msk [vmem:[#allocation11 + $0x8] sm:$0xff] %vm90_vm0, %v279_v28 }
 0x21e   :  { %v285_v31 = vld [vmem:[#allocation11] sm:$0xff] }
 0x21f   :  { %v294_v32 = vadd.f32 %v330_v30, %v285_v31 }
 0x220   :  { %v286_v33 = vld [vmem:[#allocation11 + $0x8] sm:$0xff] }
 0x221   :  { %v295_v34 = vadd.f32 %v330_v30, %v286_v33  ;;  %296 = vst.msk [vmem:[#allocation11] sm:$0xff] %vm90_vm0, %v294_v32 }
 0x223   :  { %297 = vst.msk [vmem:[#allocation11 + $0x8] sm:$0xff] %vm90_vm0, %v295_v34 }
 0x224   :  { %515 = shalt.err (!%p512_p2)
}
 0x225   :  { %s516_s7 = scalar_lea.hbm %s676_s5, 256 }
 0x226   :  { %p517_p3 = scmp.ne.s32.totalorder %s676_s5, %s516_s7  ;;  %p520_p4 = scmp.lt.u32.totalorder %s516_s7, %s676_s5 }
 0x228   :  { %p522_p5 = pnand %p520_p4, %p517_p3 }
 0x22a   :  { %525 = shalt.err (!%p522_p5)
}
 0x22b   :  { %s544_s12 = smov 128   ;;  %s545_s13 = smov 8  }
 0x22c   :  { %309 = dma.vmem_to_hbm [thread:$0]  %s304_s28, 256, %s676_s5, [#allocation4], %s544_s12, %s544_s12, %s545_s13  }
 0x22d   :  { %532 = dma.done.wait [#allocation4], 256  }
 0x22e   :  { %533 = vsyncadd [#allocation4], 4294967040 }
 0x22f   :  { %313 = vsyncpa [#allocation3], 1 }
 0x230   :  { %314 = vsyncpa [#allocation6], 1 }
 0x231   :  { %315 = vsyncpa [#allocation9], 1 }
 0x232   :  { %316 = vsyncpa [#allocation4], 1 }

</bundles_post_ra>
